<compile_context>
chip_gen: v7x
topology: tpu7x:2x2x1
jax: 0.10.0
libtpu: 0.0.40
codegen_flags: <defaults>
</compile_context>

<pallas_src>
import jax
import jax.numpy as jnp
from jax.experimental import pallas as pl
from jax.experimental.pallas import tpu as pltpu


def _round_up(v, m):
    return ((v + m - 1) // m) * m


def _vmem_capacity_bytes():
    try:
        return int(pltpu.get_tpu_info().vmem_capacity_bytes)
    except Exception:
        return 64 * 1024 * 1024  # conservative default (v7x per-TC VMEM)


def _vmem_limit(block_bytes, cap):
    # Stay well under physical VMEM (leave headroom for compiler scratch),
    # but raise the scoped limit above the small per-generation defaults.
    hard = int(0.68 * cap)
    want = max(32 << 20, int(block_bytes) + (8 << 20))
    return int(min(hard, want))


def _choose_tile_p(np_total, kp, oc, itemsize, cap):
    """Lane-tile for the conv: lane-dense, VMEM-budgeted, >=2 grid steps."""
    npp_min = _round_up(max(np_total, 1), 128)
    max_tile = 2048 if cap >= (96 << 20) else 512      # v5e/v6e vs v7x
    budget = int(0.30 * cap)
    w_bytes = 2 * oc * (kp * itemsize + 4)             # resident weights + bias
    tile = 128
    for cand in (256, 512, 1024, 2048):
        if cand > max_tile or cand > npp_min:
            break
        need = 2 * cand * (kp * itemsize + oc * 4) + w_bytes
        if need <= budget:
            tile = cand
    # Keep >=2 grid steps when there is enough work (v7x has 2 TensorCores).
    while tile > 128 and (npp_min + tile - 1) // tile < 2:
        tile //= 2
    return tile


def _choose_tile_c(n, c, h, w, oh, ow, cap):
    budget = int(0.30 * cap)
    per_c = 2 * (h * w + oh * ow) * 4                  # double-buffered in+out
    cap_c = max(1, budget // max(per_c, 1))
    divs = [d for d in range(1, c + 1) if c % d == 0 and d <= cap_c]
    tile_c = max(divs) if divs else 1
    # Expose >=2 independent grid units when possible (v7x dual TC).
    while n * (c // tile_c) < 2 and tile_c > 1:
        smaller = [d for d in divs if d < tile_c]
        if not smaller:
            break
        tile_c = max(smaller)
    return tile_c


# ---------------------------------------------------------------------------
# Conv path: Conv2d(channels, out_channels, kernel=3, stride=2, padding=1)
# ---------------------------------------------------------------------------
def _conv_kernel(xs_ref, w_ref, b_ref, o_ref):
    # xs_ref: (Kp, TP)   im2col block (K = 9*C padded; TP lanes, mult. of 128)
    # w_ref : (OC, Kp)   fused per-tap weights (resident across the grid)
    # b_ref : (OC, 1)    bias (f32)
    # o_ref : (OC, TP)   output block
    acc = jnp.dot(w_ref[...], xs_ref[...], preferred_element_type=jnp.float32)
    o_ref[...] = (acc + b_ref[...]).astype(o_ref.dtype)


def downsample_conv(x, w, b, *, compute_dtype=jnp.bfloat16, out_dtype=None,
                    tile_p=None):
    """x: (N, C, H, W), w: (OC, C, 3, 3), b: (OC,). Returns (N, OC, OH, OW)."""
    n, c, h, wd = x.shape
    oc = w.shape[0]
    oh = (h - 1) // 2 + 1          # floor((H + 2*1 - 3)/2) + 1
    ow = (wd - 1) // 2 + 1
    p = oh * ow
    out_dtype = out_dtype or x.dtype
    itemsize = jnp.dtype(compute_dtype).itemsize

    # --- im2col built directly in compute_dtype (bf16: half the HBM traffic),
    #     batch flattened onto the lane axis: xs[(t*C + c), n*P + p] ---------
    # TODO(synk): "Option A" (in-kernel taps via halo BlockSpec + manual DMA)
    # would remove this remaining XLA-side materialization.
    xq = x.astype(compute_dtype)
    xpad = jnp.pad(xq, ((0, 0), (0, 0), (1, 1), (1, 1)))
    shifts = [
        xpad[:, :, ky: ky + 2 * oh: 2, kx: kx + 2 * ow: 2]
        for ky in range(3)
        for kx in range(3)
    ]                                                        # 9 x (N, C, OH, OW)
    xs = jnp.stack(shifts, axis=0)                           # (9, N, C, OH, OW)
    xs = jnp.transpose(xs, (0, 2, 1, 3, 4)).reshape(9 * c, n * p)  # (9C, N*P)
    w9 = jnp.transpose(w, (0, 2, 3, 1)).reshape(oc, 9 * c).astype(compute_dtype)
    b2 = b.reshape(oc, 1).astype(jnp.float32)

    # --- pad the contraction (sublane) and flattened-spatial (lane) dims -----
    k = 9 * c
    k_mult = 32 // itemsize                    # 8 for f32, 16 for bf16
    kp = _round_up(k, k_mult)
    cap = _vmem_capacity_bytes()
    if tile_p is None:
        tile_p = _choose_tile_p(n * p, kp, oc, itemsize, cap)
    npp = _round_up(n * p, tile_p)
    xs = jnp.pad(xs, ((0, kp - k), (0, npp - n * p)))
    w9 = jnp.pad(w9, ((0, 0), (0, kp - k)))

    blk = 2 * tile_p * (kp * itemsize + oc * 4) + 2 * oc * (kp * itemsize + 4)
    grid = (npp // tile_p,)

    out = pl.pallas_call(
        _conv_kernel,
        out_shape=jax.ShapeDtypeStruct((oc, npp), out_dtype),
        grid_spec=pltpu.PrefetchScalarGridSpec(
            num_scalar_prefetch=0,
            grid=grid,
            in_specs=[
                pl.BlockSpec((kp, tile_p), lambda j: (0, j)),
                pl.BlockSpec((oc, kp), lambda j: (0, 0)),
                pl.BlockSpec((oc, 1), lambda j: (0, 0)),
            ],
            out_specs=pl.BlockSpec((oc, tile_p), lambda j: (0, j)),
        ),
        compiler_params=pltpu.CompilerParams(
            dimension_semantics=("parallel",),
            vmem_limit_bytes=_vmem_limit(blk, cap),
        ),
    )(xs, w9, b2)

    y = out[:, : n * p].reshape(oc, n, oh, ow)
    return jnp.transpose(y, (1, 0, 2, 3))


# ---------------------------------------------------------------------------
# Pool path: AvgPool2d(kernel_size=2, stride=2)  (use_conv=False)
# ---------------------------------------------------------------------------
def _pool_kernel(x_ref, sw_ref, o_ref):
    # x_ref : (1, TC, H, W)   input block, read straight from x (no im2col)
    # sw_ref: (W, OW)         0.25-weighted column-pair selection
    # o_ref : (1, TC, OH, OW)
    xb = x_ref[0]                                       # (TC, H, W)
    tc = xb.shape[0]
    wd = xb.shape[2]
    oh = o_ref.shape[2]
    # H-pool: stride-2 sublane add on the VPU (floor semantics for odd H).
    th = xb[:, 0: 2 * oh: 2, :] + xb[:, 1: 2 * oh: 2, :]    # (TC, OH, W)
    # W-pool: lane contraction with the 0.25-weighted selection matrix (MXU).
    o = jnp.dot(th.reshape(tc * oh, wd), sw_ref[...],
                preferred_element_type=jnp.float32)          # (TC*OH, OW)
    o_ref[0] = o.reshape(tc, oh, -1).astype(o_ref.dtype)


def downsample_avgpool(x, *, tile_c=None):
    """x: (N, C, H, W). Returns (N, C, H//2, W//2)."""
    n, c, h, wd = x.shape
    oh, ow = h // 2, wd // 2
    cap = _vmem_capacity_bytes()
    if tile_c is None:
        tile_c = _choose_tile_c(n, c, h, wd, oh, ow, cap)

    # 0.25-weighted column-pair selection; odd-W floor semantics fall out
    # (last odd column maps to no output column -> zero row).
    sw = 0.25 * (jnp.arange(wd)[:, None] // 2
                 == jnp.arange(ow)[None, :]).astype(jnp.float32)

    blk = 2 * tile_c * (h * wd + oh * ow) * 4 + 2 * wd * ow * 4
    grid = (n, c // tile_c)

    return pl.pallas_call(
        _pool_kernel,
        out_shape=jax.ShapeDtypeStruct((n, c, oh, ow), x.dtype),
        grid_spec=pltpu.PrefetchScalarGridSpec(
            num_scalar_prefetch=0,
            grid=grid,
            in_specs=[
                pl.BlockSpec((1, tile_c, h, wd), lambda i, j: (i, j, 0, 0)),
                pl.BlockSpec((wd, ow), lambda i, j: (0, 0)),
            ],
            out_specs=pl.BlockSpec((1, tile_c, oh, ow), lambda i, j: (i, j, 0, 0)),
        ),
        compiler_params=pltpu.CompilerParams(
            dimension_semantics=("parallel", "parallel"),
            vmem_limit_bytes=_vmem_limit(blk, cap),
        ),
    )(x, sw)


# ---------------------------------------------------------------------------
# Downsample module equivalent
# ---------------------------------------------------------------------------
class Downsample:
    def __init__(self, channels, use_conv, dims=2, out_channels=None, *, key=None,
                 compute_dtype=jnp.bfloat16):
        # TODO(synk): dims=1 and dims=3 (stride (1, 2, 2)) variants are not implemented.
        assert dims == 2, "this Pallas implementation covers the dims=2 case"
        self.channels = channels
        self.out_channels = out_channels or channels
        self.use_conv = use_conv
        self.compute_dtype = compute_dtype
        if use_conv:
            assert key is not None
            kw, kb = jax.random.split(key)
            fan_in = channels * 3 * 3
            bound = 1.0 / (fan_in ** 0.5)
            self.w = jax.random.uniform(
                kw, (self.out_channels, channels, 3, 3), jnp.float32, -bound, bound
            )
            self.b = jax.random.uniform(
                kb, (self.out_channels,), jnp.float32, -bound, bound
            )
        else:
            assert self.channels == self.out_channels

    def __call__(self, x):
        assert x.shape[1] == self.channels
        if self.use_conv:
            return downsample_conv(x, self.w, self.b, compute_dtype=self.compute_dtype)
        return downsample_avgpool(x)


# ---------------------------------------------------------------------------
# Reference implementations (plain JAX/XLA) for verification
# ---------------------------------------------------------------------------
def _ref_conv(x, w, b):
    y = jax.lax.conv_general_dilated(
        x, w, window_strides=(2, 2), padding=((1, 1), (1, 1)),
        dimension_numbers=("NCHW", "OIHW", "NCHW"),
    )
    return y + b[None, :, None, None]


def _ref_pool(x):
    n, c, h, wd = x.shape
    return x.reshape(n, c, h // 2, 2, wd // 2, 2).mean(axis=(3, 5))


if __name__ == "__main__":
    key = jax.random.PRNGKey(0)
    kx, kmod = jax.random.split(key)

    # Small shapes: N=2, C=4, H=W=16, out_channels=8.
    x = jax.random.normal(kx, (2, 4, 16, 16), jnp.float32)

    # use_conv=True path (default bf16 operands, f32 accumulation).
    ds_conv = Downsample(channels=4, use_conv=True, dims=2, out_channels=8, key=kmod)
    y_conv = jax.block_until_ready(ds_conv(x))
    assert y_conv.shape == (2, 8, 8, 8), y_conv.shape
    # Compare against the f32 reference evaluated on bf16-rounded operands
    # (apples-to-apples for the bf16-operand / f32-accumulate kernel).
    xq = x.astype(jnp.bfloat16).astype(jnp.float32)
    wq = ds_conv.w.astype(jnp.bfloat16).astype(jnp.float32)
    ref_cq = _ref_conv(xq, wq, ds_conv.b)
    assert jnp.allclose(y_conv, ref_cq, atol=1e-3, rtol=1e-3), "conv (bf16) mismatch"

    # use_conv=True path with full f32 operands (exact module semantics).
    ds_conv32 = Downsample(channels=4, use_conv=True, dims=2, out_channels=8,
                           key=kmod, compute_dtype=jnp.float32)
    y_conv32 = jax.block_until_ready(ds_conv32(x))
    ref_c = _ref_conv(x, ds_conv32.w, ds_conv32.b)
    assert jnp.allclose(y_conv32, ref_c, atol=1e-4, rtol=1e-4), "conv (f32) mismatch"

    # use_conv=False path (avg pool, channels preserved).
    ds_pool = Downsample(channels=4, use_conv=False, dims=2)
    y_pool = jax.block_until_ready(ds_pool(x))
    assert y_pool.shape == (2, 4, 8, 8), y_pool.shape
    ref_p = _ref_pool(x)
    assert jnp.allclose(y_pool, ref_p, atol=1e-3, rtol=1e-3), "pool mismatch"

    print("KERNEL_OK")
</pallas_src>

<mosaic_0001>
module attributes {stable_mosaic.version = 11 : i64} {
  func.func @_conv_kernel(%arg0: i32, %arg1: memref<48x128xbf16, #tpu.memory_space<vmem>>, %arg2: memref<8x48xbf16, #tpu.memory_space<vmem>>, %arg3: memref<8x1xf32, #tpu.memory_space<vmem>>, %arg4: memref<8x128xf32, #tpu.memory_space<vmem>>) attributes {dimension_semantics = [#tpu.dimension_semantics<parallel>], iteration_bounds = array<i64: 1>, scalar_prefetch = 0 : i64, scratch_operands = 0 : i64, tpu.core_type = #tpu.core_type<tc>, window_params = [{transform_indices = @transform_0, window_bounds = array<i64: 48, 128>}, {pipeline_mode = #tpu.pipeline_mode<synchronous>, transform_indices = @transform_1, window_bounds = array<i64: 8, 48>}, {pipeline_mode = #tpu.pipeline_mode<synchronous>, transform_indices = @transform_2, window_bounds = array<i64: 8, 1>}, {transform_indices = @transform_3, window_bounds = array<i64: 8, 128>}]} {
    %c0 = arith.constant 0 : index
    %c0_0 = arith.constant 0 : index
    %0 = vector.load %arg2[%c0, %c0_0] : memref<8x48xbf16, #tpu.memory_space<vmem>>, vector<8x48xbf16>
    %c0_1 = arith.constant 0 : index
    %c0_2 = arith.constant 0 : index
    %1 = vector.load %arg1[%c0_1, %c0_2] : memref<48x128xbf16, #tpu.memory_space<vmem>>, vector<48x128xbf16>
    %cst = arith.constant dense<0.000000e+00> : vector<8x128xf32>
    %2 = tpu.matmul %0, %1, %cst {dimension_numbers = #tpu.dot_dimension_numbers<[1], [0], [0], [1], [0, 0, 1, 1], [], []>} : vector<8x48xbf16>, vector<48x128xbf16>, vector<8x128xf32> -> vector<8x128xf32>
    %c0_3 = arith.constant 0 : index
    %c0_4 = arith.constant 0 : index
    %3 = vector.load %arg3[%c0_3, %c0_4] : memref<8x1xf32, #tpu.memory_space<vmem>>, vector<8x1xf32>
    %4 = vector.broadcast %3 : vector<8x1xf32> to vector<8x128xf32>
    %5 = arith.addf %2, %4 : vector<8x128xf32>
    %c0_5 = arith.constant 0 : index
    %c0_6 = arith.constant 0 : index
    %6 = vector.load %arg4[%c0_5, %c0_6] : memref<8x128xf32, #tpu.memory_space<vmem>>, vector<8x128xf32>
    tpu.vector_store %arg4[%c0_5, %c0_6], %5 {strides = array<i32>} : memref<8x128xf32, #tpu.memory_space<vmem>>, vector<8x128xf32>,
    return
  }
  func.func @transform_0(%arg0: i32) -> (i32, i32) {
    %c0_i32 = arith.constant 0 : i32
    %c0_i32_0 = arith.constant 0 : i32
    return %c0_i32, %arg0 : i32, i32
  }
  func.func @transform_1(%arg0: i32) -> (i32, i32) {
    %c0_i32 = arith.constant 0 : i32
    %c0_i32_0 = arith.constant 0 : i32
    %c0_i32_1 = arith.constant 0 : i32
    return %c0_i32, %c0_i32_0 : i32, i32
  }
  func.func @transform_2(%arg0: i32) -> (i32, i32) {
    %c0_i32 = arith.constant 0 : i32
    %c0_i32_0 = arith.constant 0 : i32
    %c0_i32_1 = arith.constant 0 : i32
    return %c0_i32, %c0_i32_0 : i32, i32
  }
  func.func @transform_3(%arg0: i32) -> (i32, i32) {
    %c0_i32 = arith.constant 0 : i32
    %c0_i32_0 = arith.constant 0 : i32
    return %c0_i32, %arg0 : i32, i32
  }
}

</mosaic_0001>

<bundles_post_ra>
// kernel: tpu_custom_call.1
= control target key start
LH: loop header
LB: loop body
LE: loop exit
PB: predicated region body
PF: predicated region fallthrough
CT: control target
= control target key end

     0   :  { %8 = vsyncpa [#allocation3], 0  ;;  %s255_s0 = inlined_call_operand.hbm [shape: bf16[48,128], index: 0, kind: input, shape index: {}]   ;;  %s256_s1 = inlined_call_operand.vmem [shape: bf16[8,48], index: 1, kind: input, shape index: {}]   ;;  %s257_s2 = inlined_call_operand.vmem [shape: f32[8,1], index: 2, kind: input, shape index: {}]   ;;  %s258_s3 = inlined_call_operand.hbm [shape: f32[8,128], index: 3, kind: output, shape index: {}]  }
   0x1   :  { %9 = vsyncpa [#allocation4], 0  ;;  %s198_s12 = smov [#allocation2]   ;;  %s150_s16 = scalar_lea.hbm %s255_s0, 384 }
   0x2   :  { %s15_s13 = sshll.u32 %s198_s12, 4  ;;  %p151_p0 = scmp.ne.s32.totalorder %s255_s0, %s150_s16  ;;  %s16_s13 = int_to_ptr.vmem [resolvable:$true] %s15_s13 }
   0x3   :  { %p154_p1 = scmp.lt.u32.totalorder %s150_s16, %s255_s0 }
   0x5   :  { %p156_p2 = pnand %p154_p1, %p151_p0 }
   0x7   :  { %159 = shalt.err (!%p156_p2)
}
   0x8   :  { %s160_s21 = scalar_lea.vmem %s16_s13, 384  ;;  %p165_p4 = scmp.lt.s32.totalorder %s16_s13, %s16_s13 }
   0x9   :  { %p161_p3 = scmp.ne.s32.totalorder %s16_s13, %s160_s21  ;;  %p166_p5 = scmp.lt.s32.totalorder %s160_s21, %s160_s21 }
   0xb   :  { %p167_p6 = por %p166_p5, %p165_p4 }
   0xd   :  { %p168_p7 = pnand %p167_p6, %p161_p3 }
   0xf   :  { %171 = shalt.err (!%p168_p7)
}
  0x10   :  { %s199_s22 = smov 64   ;;  %s200_s23 = smov 4  }
  0x11   :  { %21 = dma.hbm_to_vmem [thread:$0]  %s255_s0, 384, %s16_s13, [#allocation3], %s199_s22, %s199_s22, %s200_s23  }
  0x12   :  { %194 = dma.done.wait [#allocation3], 384  }
  0x13   :  { %195 = vsyncadd [#allocation3], 4294966912  ;;  %v201_v0 = vmov 0.0   ;;  %vm202_vm0 = vmmov 0   ;;  %v203_v1 = vmov 0   ;;  %v147_v2 = vld [vmem:[#allocation2] sm:$0xff]  }
  0x14   :  { %129 = vmatprep.subr.bf16.mxu0 %v201_v0  ;;  %135 = vmatprep.mubr.msk.bf16.mxu0 %vm202_vm0, %v201_v0  ;;  %v148_v3 = vld [vmem:[#allocation2 + $0x8] sm:$0xff]   ;;  %v37_v4 = vld [vmem:[%s257_s2] sm:$0xff]  ;;  %v149_v5 = vld [vmem:[#allocation2 + $0x10] sm:$0xff]   ;;  %vm61_vm1 = vcmask 392192   ;;  %s204_s29 = smov [#allocation5]  }
  0x15   :  { %146 = vset.pattern.permute.xlu0 %v203_v1  ;;  %130 = vmatpush3.bf16.msra.mxu0 %v147_v2  ;;  %v30_v6 = vld [vmem:[%s256_s1] sm:$0xf]  ;;  %s112_s30 = sshll.u32 %s204_s29, 4  ;;  %s113_s30 = int_to_ptr.vmem [resolvable:$true] %s112_s30 }
  0x16   :  { %131 = vmatprep.subr.bf16.mxu0 %v201_v0  ;;  %40 = vperm.xlu0 %146, %v37_v4   ;;  %s172_s2 = scalar_lea.vmem %s113_s30, 128  ;;  %p177_p9 = scmp.lt.s32.totalorder %s113_s30, %s113_s30 }
  0x17   :  { %p173_p8 = scmp.ne.s32.totalorder %s113_s30, %s172_s2  ;;  %p178_p10 = scmp.lt.s32.totalorder %s172_s2, %s172_s2 }
  0x19   :  { %132 = vmatpush3.bf16.msra.mxu0 %v148_v3  ;;  %p179_p11 = por %p178_p10, %p177_p9 }
  0x1a   :  { %133 = vmatprep.subr.bf16.mxu0 %v201_v0 }
  0x1b   :  { %p180_p12 = pnand %p179_p11, %p173_p8 }
  0x1d   :  { %134 = vmatpush3.bf16.msra.mxu0 %v149_v5 }
  0x20   :  { %136 = vmatmul.mubr.msk.bf16.vlgmr.msra.gmra.mrb[0].mxu0 %vm61_vm1, %v30_v6 }
  0x95   :  { %v41_v7 = vpop.permute.xlu0 %40 }
  0xf3   :  { %v99_v8 = vpop.f32.mrb[0].mxu0 }
  0xf4   :  { %v100_v9 = vadd.f32 %v99_v8, %v41_v7  ;;  %v137_v10 = vpop.f32.mrb[1].mxu0 }
  0xf5   :  { %v102_v11 = vpop.f32.mrb[2].mxu0 }
  0xf6   :  { %105 = vst [vmem:[#allocation5] sm:$0xff] %v100_v9  ;;  %v138_v12 = vpop.f32.mrb[3].mxu0 }
  0xf7   :  { %183 = shalt.err (!%p180_p12)
}
  0xf8   :  { %s184_s5 = scalar_lea.hbm %s258_s3, 128 }
  0xf9   :  { %p185_p13 = scmp.ne.s32.totalorder %s258_s3, %s184_s5  ;;  %p188_p0 = scmp.lt.u32.totalorder %s184_s5, %s258_s3 }
  0xfb   :  { %p190_p1 = pnand %p188_p0, %p185_p13 }
  0xfd   :  { %193 = shalt.err (!%p190_p1)
}
  0xfe   :  { %115 = dma.vmem_to_hbm [thread:$0]  %s113_s30, 128, %s258_s3, [#allocation4]  }
  0xff   :  { %196 = dma.done.wait [#allocation4], 128  }
 0x100   :  { %197 = vsyncadd [#allocation4], 4294967168 }
 0x101   :  { %119 = vsyncpa [#allocation3], 1 }
 0x102   :  { %120 = vsyncpa [#allocation4], 1 }

</bundles_post_ra>
